<compile_context>
chip_gen: v7x
topology: tpu7x:2x2x1
jax: 0.10.0
libtpu: 0.0.40
codegen_flags: <defaults>
</compile_context>

<pallas_src>
import jax
import jax.numpy as jnp
from jax.experimental import pallas as pl
from jax.experimental.pallas import tpu as pltpu

_LANE = 128
# ~2 MiB per f32 block (0.5M elements): large enough that the ~0.35 us
# per-grid-step overhead is negligible, small enough that 2 (double-buffer)
# x 2 (in + out) buffers fit every generation's VMEM with big headroom.
_TARGET_BLOCK_ELEMS = 512 * 1024
# Candidate lane-dense widths, widest first.
_WIDTHS = (2048, 1024, 512, 256, 128)


def _sublane_multiple(dtype) -> int:
    # Packed sub-32-bit dtypes occupy more sublanes per vreg.
    return {4: 8, 2: 16, 1: 32}.get(jnp.dtype(dtype).itemsize, 8)


def _shifted_relu_kernel(bias_ref, x_ref, o_ref):
    # Pure VPU elementwise: one sub + one max per element.
    x = x_ref[...]
    b = bias_ref[0].astype(x.dtype)          # single SMEM scalar load
    o_ref[...] = jnp.maximum(x - b, jnp.zeros((), x.dtype))


def _launch(x2d, bias_arr, tile_rows, width):
    rows = x2d.shape[0]
    tile_bytes = tile_rows * width * x2d.dtype.itemsize
    # Budget: 2 buffers per input + 2 per output (double buffering) + headroom.
    vmem_limit = int(max(4 * tile_bytes + (2 << 20), 16 << 20))
    grid = (pl.cdiv(rows, tile_rows),)
    return pl.pallas_call(
        _shifted_relu_kernel,
        out_shape=jax.ShapeDtypeStruct((rows, width), x2d.dtype),
        grid_spec=pltpu.PrefetchScalarGridSpec(
            num_scalar_prefetch=0,
            grid=grid,
            in_specs=[
                pl.BlockSpec(memory_space=pltpu.MemorySpace.SMEM),  # bias scalar
                pl.BlockSpec((tile_rows, width), lambda i: (i, 0)),
            ],
            out_specs=pl.BlockSpec((tile_rows, width), lambda i: (i, 0)),
        ),
        compiler_params=pltpu.CompilerParams(
            dimension_semantics=("parallel",),   # shards grid across v7x's 2 TCs
            vmem_limit_bytes=vmem_limit,
        ),
    )(bias_arr, x2d)


def _pick_tile_rows(rows, width, sub_mult):
    tile_rows = max((_TARGET_BLOCK_ELEMS // width) // sub_mult * sub_mult, sub_mult)
    if rows <= tile_rows:
        return rows            # one block spanning the full (possibly odd) dim
    return tile_rows           # multiple of sub_mult; ragged last block is OK


def shifted_relu(x, bias: float = 0.0):
    """Pallas implementation of F.relu(x - bias) for arbitrary-shaped x."""
    orig_shape = x.shape
    n = x.size
    if n == 0:
        return x
    sub_mult = _sublane_multiple(x.dtype)
    bias_arr = jnp.asarray([bias], dtype=jnp.float32)
    x_flat = x.reshape(-1)

    # Fast path: widest lane-dense width that divides the element count, so no
    # padding and no post-slice copy are needed (pure reshapes around the call).
    for width in _WIDTHS:
        if n % width == 0:
            rows = n // width
            tile_rows = _pick_tile_rows(rows, width, sub_mult)
            out2d = _launch(x_flat.reshape(rows, width), bias_arr, tile_rows, width)
            return out2d.reshape(orig_shape)

    # Rare fallback: element count not a multiple of 128. Pad the flat tail to
    # a lane boundary, run, then slice the valid prefix back out.
    width = _LANE
    n_pad = pl.cdiv(n, width) * width
    x_pad = jnp.pad(x_flat, (0, n_pad - n))
    rows = n_pad // width
    tile_rows = _pick_tile_rows(rows, width, sub_mult)
    out2d = _launch(x_pad.reshape(rows, width), bias_arr, tile_rows, width)
    return out2d.reshape(-1)[:n].reshape(orig_shape)


if __name__ == "__main__":
    key = jax.random.PRNGKey(0)

    # Small NCHW input consistent with a conv-style activation module.
    x = jax.random.normal(key, (2, 4, 16, 16), dtype=jnp.float32)
    bias = 0.5  # ShiftedReLU(bias=0.5)
    y = shifted_relu(x, bias)
    jax.block_until_ready(y)
    y_ref = jnp.maximum(x - bias, 0.0)
    assert y.shape == x.shape and y.dtype == x.dtype
    assert jnp.allclose(y, y_ref, atol=0.0, rtol=0.0), "mismatch vs reference (f32)"

    # Unaligned shape + negative bias exercises the padded fallback path
    # (padded tail computes nonzero values but is sliced off).
    x2 = jax.random.normal(jax.random.PRNGKey(1), (3, 5, 7), dtype=jnp.float32)
    y2 = shifted_relu(x2, -0.25)
    y2_ref = jnp.maximum(x2 - (-0.25), 0.0)
    assert jnp.allclose(y2, y2_ref, atol=0.0, rtol=0.0), "mismatch vs reference (padded)"

    # bf16 path (16-sublane row tiling); bias exactly representable in bf16.
    x3 = jax.random.normal(jax.random.PRNGKey(2), (2, 8, 16, 16), dtype=jnp.bfloat16)
    y3 = shifted_relu(x3, 0.5)
    y3_ref = jnp.maximum(x3 - jnp.asarray(0.5, jnp.bfloat16), jnp.asarray(0, jnp.bfloat16))
    assert y3.dtype == x3.dtype
    assert jnp.allclose(y3.astype(jnp.float32), y3_ref.astype(jnp.float32)), "mismatch (bf16)"

    print("KERNEL_OK")
</pallas_src>

<mosaic_0001>
module attributes {stable_mosaic.version = 11 : i64} {
  func.func @_shifted_relu_kernel(%arg0: i32, %arg1: memref<1xf32, #tpu.memory_space<smem>>, %arg2: memref<1x2048xf32, #tpu.memory_space<vmem>>, %arg3: memref<1x2048xf32, #tpu.memory_space<vmem>>) attributes {dimension_semantics = [#tpu.dimension_semantics<parallel>], iteration_bounds = array<i64: 1>, scalar_prefetch = 0 : i64, scratch_operands = 0 : i64, tpu.core_type = #tpu.core_type<tc>, window_params = [{transform_indices = @transform_0, window_bounds = array<i64: 1>}, {transform_indices = @transform_1, window_bounds = array<i64: 1, 2048>}, {transform_indices = @transform_2, window_bounds = array<i64: 1, 2048>}]} {
    %c0 = arith.constant 0 : index
    %c0_0 = arith.constant 0 : index
    %0 = vector.load %arg2[%c0, %c0_0] : memref<1x2048xf32, #tpu.memory_space<vmem>>, vector<1x2048xf32>
    %c0_1 = arith.constant 0 : index
    %1 = memref.load %arg1[%c0_1] : memref<1xf32, #tpu.memory_space<smem>>
    %2 = vector.broadcast %1 : f32 to vector<1x2048xf32>
    %3 = arith.subf %0, %2 : vector<1x2048xf32>
    %cst = arith.constant 0.000000e+00 : f32
    %4 = vector.broadcast %cst : f32 to vector<1x2048xf32>
    %5 = arith.maximumf %3, %4 : vector<1x2048xf32>
    %c0_2 = arith.constant 0 : index
    %c0_3 = arith.constant 0 : index
    %6 = vector.load %arg3[%c0_2, %c0_3] : memref<1x2048xf32, #tpu.memory_space<vmem>>, vector<1x2048xf32>
    tpu.vector_store %arg3[%c0_2, %c0_3], %5 {strides = array<i32>} : memref<1x2048xf32, #tpu.memory_space<vmem>>, vector<1x2048xf32>,
    return
  }
  func.func @transform_0(%arg0: i32) -> i32 {
    %c0_i32 = arith.constant 0 : i32
    %c0_i32_0 = arith.constant 0 : i32
    return %c0_i32 : i32
  }
  func.func @transform_1(%arg0: i32) -> (i32, i32) {
    %c0_i32 = arith.constant 0 : i32
    %c0_i32_0 = arith.constant 0 : i32
    return %arg0, %c0_i32 : i32, i32
  }
  func.func @transform_2(%arg0: i32) -> (i32, i32) {
    %c0_i32 = arith.constant 0 : i32
    %c0_i32_0 = arith.constant 0 : i32
    return %arg0, %c0_i32 : i32, i32
  }
}

</mosaic_0001>

<bundles_post_ra>
// kernel: tpu_custom_call.1
= control target key start
LH: loop header
LB: loop body
LE: loop exit
PB: predicated region body
PF: predicated region fallthrough
CT: control target
= control target key end

     0   :  { %8 = vsyncpa [#allocation4], 0  ;;  %s144_s0 = inlined_call_operand.<no memory space> [shape: f32[1], index: 0, kind: input, shape index: {}]   ;;  %s145_s1 = inlined_call_operand.hbm [shape: f32[1,2048], index: 1, kind: input, shape index: {}]   ;;  %s146_s2 = inlined_call_operand.hbm [shape: f32[1,2048], index: 2, kind: output, shape index: {}]  }
   0x1   :  { %9 = vsyncpa [#allocation5], 0  ;;  %s100_s9 = smov [#allocation3]   ;;  %s52_s13 = scalar_lea.hbm %s145_s1, 256 }
   0x2   :  { %s18_s10 = sshll.u32 %s100_s9, 4  ;;  %p53_p0 = scmp.ne.s32.totalorder %s145_s1, %s52_s13  ;;  %s19_s10 = int_to_ptr.vmem [resolvable:$true] %s18_s10 }
   0x3   :  { %p56_p1 = scmp.lt.u32.totalorder %s52_s13, %s145_s1 }
   0x5   :  { %p58_p2 = pnand %p56_p1, %p53_p0 }
   0x7   :  { %61 = shalt.err (!%p58_p2)
}
   0x8   :  { %s62_s18 = scalar_lea.vmem %s19_s10, 256  ;;  %p67_p4 = scmp.lt.s32.totalorder %s19_s10, %s19_s10 }
   0x9   :  { %p63_p3 = scmp.ne.s32.totalorder %s19_s10, %s62_s18  ;;  %p68_p5 = scmp.lt.s32.totalorder %s62_s18, %s62_s18 }
   0xb   :  { %p69_p6 = por %p68_p5, %p67_p4 }
   0xd   :  { %p70_p7 = pnand %p69_p6, %p63_p3 }
   0xf   :  { %73 = shalt.err (!%p70_p7)
}
  0x10   :  { %21 = dma.hbm_to_vmem [thread:$0]  %s145_s1, 256, %s19_s10, [#allocation4]  }
  0x11   :  { %96 = dma.done.wait [#allocation4], 256  }
  0x12   :  { %97 = vsyncadd [#allocation4], 4294967040  ;;  %v28_v0 = vstv %s144_s0  ;;  %v25_v1 = vld [vmem:[#allocation3] sm:$0xff]  ;;  %v26_v2 = vld [vmem:[#allocation3 + $0x8] sm:$0xff]  ;;  %s101_s23 = smov [#allocation6]  }
  0x13   :  { %s41_s24 = sshll.u32 %s101_s23, 4  ;;  %v29_v3 = vsub.f32 %v25_v1, %v28_v0  ;;  %v30_v4 = vsub.f32 %v26_v2, %v28_v0  ;;  %s42_s24 = int_to_ptr.vmem [resolvable:$true] %s41_s24 }
  0x14   :  { %s74_s25 = scalar_lea.vmem %s42_s24, 256  ;;  %p79_p9 = scmp.lt.s32.totalorder %s42_s24, %s42_s24 }
  0x15   :  { %v31_v5 = vmax.f32 %v29_v3, 0.0  ;;  %v32_v6 = vmax.f32 %v30_v4, 0.0  ;;  %p75_p8 = scmp.ne.s32.totalorder %s42_s24, %s74_s25  ;;  %p80_p10 = scmp.lt.s32.totalorder %s74_s25, %s74_s25 }
  0x17   :  { %33 = vst [vmem:[#allocation6] sm:$0xff] %v31_v5  ;;  %34 = vst [vmem:[#allocation6 + $0x8] sm:$0xff] %v32_v6  ;;  %p81_p11 = por %p80_p10, %p79_p9 }
  0x19   :  { %p82_p12 = pnand %p81_p11, %p75_p8 }
  0x1b   :  { %85 = shalt.err (!%p82_p12)
}
  0x1c   :  { %s86_s26 = scalar_lea.hbm %s146_s2, 256 }
  0x1d   :  { %p87_p13 = scmp.ne.s32.totalorder %s146_s2, %s86_s26  ;;  %p90_p0 = scmp.lt.u32.totalorder %s86_s26, %s146_s2 }
  0x1f   :  { %p92_p1 = pnand %p90_p0, %p87_p13 }
  0x21   :  { %95 = shalt.err (!%p92_p1)
}
  0x22   :  { %44 = dma.vmem_to_hbm [thread:$0]  %s42_s24, 256, %s146_s2, [#allocation5]  }
  0x23   :  { %98 = dma.done.wait [#allocation5], 256  }
  0x24   :  { %99 = vsyncadd [#allocation5], 4294967040 }
  0x25   :  { %48 = vsyncpa [#allocation4], 1 }
  0x26   :  { %49 = vsyncpa [#allocation5], 1 }

</bundles_post_ra>
